<compile_context>
chip_gen: v5e
topology: v5e:2x2
jax: 0.10.0
libtpu: 0.0.40
codegen_flags: <defaults>
</compile_context>

<pallas_src>
import jax
import jax.numpy as jnp
import numpy as np
from jax.experimental import pallas as pl
from jax.experimental.pallas import tpu as pltpu


# ---------------------------------------------------------------------------
# Buffer construction — mirrors Rotary.__init__ exactly.
# ---------------------------------------------------------------------------
def make_rotary_tables(dim: int, max_seq_len: int):
    angular_freq = (1.0 / 1024.0) ** jnp.linspace(0.0, 1.0, num=dim // 4,
                                                  dtype=jnp.float32)
    angular_freq = jnp.concatenate(
        [angular_freq, jnp.zeros((dim // 4,), dtype=jnp.float32)])
    t = jnp.arange(max_seq_len, dtype=jnp.float32)
    theta = jnp.einsum("i,j->ij", t, angular_freq)      # (max_seq_len, dim // 2)
    return jnp.cos(theta), jnp.sin(theta)


# ---------------------------------------------------------------------------
# Pallas kernel: elementwise rotary with a single lane roll, full-width store.
# ---------------------------------------------------------------------------
def _rotary_kernel(cos_ref, sin_ref, x_ref, o_ref):
    # x_ref / o_ref : (tq, H, D)      cos_ref / sin_ref : (tq, D)
    # cos_ref holds [cos|cos]; sin_ref holds [sin|-sin] (sign folded outside).
    xf = x_ref[...].astype(jnp.float32)
    dh = xf.shape[-1] // 2
    # Rotate-half within each head: lanes [x1|x2] -> [x2|x1].  A roll by D/2
    # along the lane axis is its own inverse, so direction is irrelevant.
    xr = pltpu.roll(xf, shift=dh, axis=2)
    c = cos_ref[...][:, None, :]          # (tq, 1, D) -> broadcast over heads
    s = sin_ref[...][:, None, :]
    o_ref[...] = (xf * c + xr * s).astype(o_ref.dtype)


# ---------------------------------------------------------------------------
# Tile / VMEM sizing helpers.
# ---------------------------------------------------------------------------
def _round_up(x, m):
    return (x + m - 1) // m * m


def _vmem_budget_bytes():
    # Physical VMEM differs per generation (v5e/v6e: 128 MiB/TC, v7x: 64 MiB/TC).
    try:
        cap = pltpu.get_tpu_info().vmem_capacity_bytes
    except Exception:
        cap = 64 * 1024 * 1024
    # A few MiB per slab already hides per-step overhead; stay conservative.
    return min(cap // 3, 24 * 1024 * 1024)


def _pick_seq_tile(T, H, D, itemsize, vmem_budget):
    hp = _round_up(H, 8)      # sublane padding of the (H, D) trailing tile
    dp = _round_up(D, 128)    # lane padding
    bytes_per_row_x = hp * dp * itemsize        # one t-row of the x / out block
    bytes_per_row_tab = 2 * dp * 4              # cos2 + sin2 rows, f32
    # x in + out, double buffered, plus double-buffered tables.
    per_row = 4 * bytes_per_row_x + 2 * bytes_per_row_tab
    cap = min(T, max(8, vmem_budget // per_row))
    tq = 1
    for d in range(int(cap), 0, -1):            # largest divisor of T <= cap
        if T % d == 0:
            tq = d
            break
    return tq


# ---------------------------------------------------------------------------
# Wrapper: builds sign-folded tables, picks the tile, launches pallas_call.
# ---------------------------------------------------------------------------
def rotary_forward(x_BTHD, cos, sin, *, tq=None):
    B, T, H, D = x_BTHD.shape
    assert cos.shape[0] >= T, "max_seq_len must cover the input sequence"
    assert D % 2 == 0 and cos.shape[1] == D // 2

    # Sign-folded, full-width tables (tiny: T x D f32 each).
    cos_t = cos[:T].astype(jnp.float32)
    sin_t = sin[:T].astype(jnp.float32)
    cos2 = jnp.concatenate([cos_t, cos_t], axis=-1)        # (T, D) = [cos | cos]
    sin2 = jnp.concatenate([sin_t, -sin_t], axis=-1)       # (T, D) = [sin | -sin]

    itemsize = jnp.dtype(x_BTHD.dtype).itemsize
    if tq is None:
        tq = _pick_seq_tile(T, H, D, itemsize, _vmem_budget_bytes())
    # Keep >= 2 grid steps when possible so 2-TC parts (v7x) can shard.
    if B * (T // tq) < 2 and tq % 2 == 0:
        tq //= 2
    tq = max(tq, 1)
    assert T % tq == 0

    grid = (T // tq, B)   # batch innermost -> cos/sin blocks reused across B

    hp = _round_up(H, 8)
    dp = _round_up(D, 128)
    blk_x = tq * hp * dp * itemsize
    blk_tab = tq * dp * 4
    vmem_need = 2 * (2 * blk_x + 2 * blk_tab)   # double-buffered in/out + tables
    vmem_limit = int(max(16 * 2**20, min(2 * vmem_need, 64 * 2**20)))

    return pl.pallas_call(
        _rotary_kernel,
        out_shape=jax.ShapeDtypeStruct((B, T, H, D), x_BTHD.dtype),
        grid_spec=pltpu.PrefetchScalarGridSpec(
            num_scalar_prefetch=0,
            grid=grid,
            in_specs=[
                pl.BlockSpec((tq, D), lambda t, b: (t, 0)),                 # cos2
                pl.BlockSpec((tq, D), lambda t, b: (t, 0)),                 # sin2
                pl.BlockSpec((None, tq, H, D), lambda t, b: (b, t, 0, 0)),  # x
            ],
            out_specs=pl.BlockSpec((None, tq, H, D), lambda t, b: (b, t, 0, 0)),
        ),
        compiler_params=pltpu.CompilerParams(
            dimension_semantics=("parallel", "parallel"),
            vmem_limit_bytes=vmem_limit,
        ),
    )(cos2, sin2, x_BTHD)


# ---------------------------------------------------------------------------
# Pure-JAX reference (direct transcription of the PyTorch forward).
# ---------------------------------------------------------------------------
def rotary_reference(x_BTHD, cos, sin):
    T = x_BTHD.shape[-3]
    c = cos[None, :T, None, :]
    s = sin[None, :T, None, :]
    xf = x_BTHD.astype(jnp.float32)
    dh = xf.shape[-1] // 2
    x1, x2 = xf[..., :dh], xf[..., dh:]
    y1 = x1 * c + x2 * s
    y2 = x1 * (-s) + x2 * c
    return jnp.concatenate([y1, y2], axis=-1).astype(x_BTHD.dtype)


if __name__ == "__main__":
    # Small shapes consistent with the module's (B, T, H, D) convention;
    # D=128 matches the usual GPT head_dim and exercises the lane-dense path.
    dim = 128           # head dim D
    max_seq_len = 64
    B, T, H, D = 2, 32, 4, dim

    cos, sin = make_rotary_tables(dim, max_seq_len)

    key = jax.random.PRNGKey(0)
    x = jax.random.normal(key, (B, T, H, D), dtype=jnp.float32).astype(jnp.bfloat16)

    out = rotary_forward(x, cos, sin)
    out = jax.block_until_ready(out)

    ref = rotary_reference(x, cos, sin)
    np.testing.assert_allclose(np.asarray(out, dtype=np.float32),
                               np.asarray(ref, dtype=np.float32),
                               rtol=1e-2, atol=1e-2)
    assert out.shape == x.shape and out.dtype == x.dtype
    print("KERNEL_OK")
</pallas_src>

<mosaic_0001>
module attributes {stable_mosaic.version = 11 : i64} {
  func.func @_rotary_kernel(%arg0: i32, %arg1: i32, %arg2: memref<32x128xf32, #tpu.memory_space<vmem>>, %arg3: memref<32x128xf32, #tpu.memory_space<vmem>>, %arg4: memref<1x32x4x128xbf16, #tpu.memory_space<vmem>>, %arg5: memref<1x32x4x128xbf16, #tpu.memory_space<vmem>>) attributes {dimension_semantics = [#tpu.dimension_semantics<parallel>, #tpu.dimension_semantics<parallel>], iteration_bounds = array<i64: 1, 2>, scalar_prefetch = 0 : i64, scratch_operands = 0 : i64, tpu.core_type = #tpu.core_type<tc>, window_params = [{transform_indices = @transform_0, window_bounds = array<i64: 32, 128>}, {transform_indices = @transform_1, window_bounds = array<i64: 32, 128>}, {transform_indices = @transform_2, window_bounds = array<i64: 1, 32, 4, 128>}, {transform_indices = @transform_3, window_bounds = array<i64: 1, 32, 4, 128>}]} {
    %c0 = arith.constant 0 : index
    %c0_0 = arith.constant 0 : index
    %c0_1 = arith.constant 0 : index
    %c0_2 = arith.constant 0 : index
    %0 = vector.load %arg4[%c0, %c0_0, %c0_1, %c0_2] : memref<1x32x4x128xbf16, #tpu.memory_space<vmem>>, vector<1x32x4x128xbf16>
    %1 = vector.shape_cast %0 : vector<1x32x4x128xbf16> to vector<32x4x128xbf16>
    %2 = arith.extf %1 : vector<32x4x128xbf16> to vector<32x4x128xf32>
    %c64_i32 = arith.constant 64 : i32
    %3 = tpu.dynamic_rotate %2 by %c64_i32 dim 2 : vector<32x4x128xf32>, i32 -> vector<32x4x128xf32>
    %c0_3 = arith.constant 0 : index
    %c0_4 = arith.constant 0 : index
    %4 = vector.load %arg2[%c0_3, %c0_4] : memref<32x128xf32, #tpu.memory_space<vmem>>, vector<32x128xf32>
    %5 = vector.shape_cast %4 : vector<32x128xf32> to vector<32x1x128xf32>
    %c0_5 = arith.constant 0 : index
    %c0_6 = arith.constant 0 : index
    %6 = vector.load %arg3[%c0_5, %c0_6] : memref<32x128xf32, #tpu.memory_space<vmem>>, vector<32x128xf32>
    %7 = vector.shape_cast %6 : vector<32x128xf32> to vector<32x1x128xf32>
    %8 = vector.broadcast %5 : vector<32x1x128xf32> to vector<32x4x128xf32>
    %9 = arith.mulf %2, %8 : vector<32x4x128xf32>
    %10 = vector.broadcast %7 : vector<32x1x128xf32> to vector<32x4x128xf32>
    %11 = arith.mulf %3, %10 : vector<32x4x128xf32>
    %12 = arith.addf %9, %11 : vector<32x4x128xf32>
    %13 = arith.truncf %12 : vector<32x4x128xf32> to vector<32x4x128xbf16>
    %c0_7 = arith.constant 0 : index
    %c0_8 = arith.constant 0 : index
    %c0_9 = arith.constant 0 : index
    %c0_10 = arith.constant 0 : index
    %14 = vector.load %arg5[%c0_7, %c0_8, %c0_9, %c0_10] : memref<1x32x4x128xbf16, #tpu.memory_space<vmem>>, vector<1x32x4x128xbf16>
    %15 = vector.shape_cast %14 : vector<1x32x4x128xbf16> to vector<32x4x128xbf16>
    %16 = vector.shape_cast %13 : vector<32x4x128xbf16> to vector<1x32x4x128xbf16>
    tpu.vector_store %arg5[%c0_7, %c0_8, %c0_9, %c0_10], %16 {strides = array<i32>} : memref<1x32x4x128xbf16, #tpu.memory_space<vmem>>, vector<1x32x4x128xbf16>,
    return
  }
  func.func @transform_0(%arg0: i32, %arg1: i32) -> (i32, i32) {
    %c0_i32 = arith.constant 0 : i32
    %c0_i32_0 = arith.constant 0 : i32
    return %arg0, %c0_i32 : i32, i32
  }
  func.func @transform_1(%arg0: i32, %arg1: i32) -> (i32, i32) {
    %c0_i32 = arith.constant 0 : i32
    %c0_i32_0 = arith.constant 0 : i32
    return %arg0, %c0_i32 : i32, i32
  }
  func.func @transform_2(%arg0: i32, %arg1: i32) -> (i32, i32, i32, i32) {
    %c0_i32 = arith.constant 0 : i32
    %c0_i32_0 = arith.constant 0 : i32
    %c0_i32_1 = arith.constant 0 : i32
    return %arg1, %arg0, %c0_i32, %c0_i32_0 : i32, i32, i32, i32
  }
  func.func @transform_3(%arg0: i32, %arg1: i32) -> (i32, i32, i32, i32) {
    %c0_i32 = arith.constant 0 : i32
    %c0_i32_0 = arith.constant 0 : i32
    %c0_i32_1 = arith.constant 0 : i32
    return %arg1, %arg0, %c0_i32, %c0_i32_0 : i32, i32, i32, i32
  }
}

</mosaic_0001>

<bundles_post_ra>
// kernel: tpu_custom_call.1
= control target key start
LH: loop header
LB: loop body
LE: loop exit
PB: predicated region body
PF: predicated region fallthrough
CT: control target
= control target key end

     0   :  { %s1899_s0 = inlined_call_operand.hbm [shape: f32[32,128], index: 0, kind: input, shape index: {}]   ;;  %s1900_s1 = inlined_call_operand.hbm [shape: f32[32,128], index: 1, kind: input, shape index: {}]   ;;  %s1901_s2 = inlined_call_operand.hbm [shape: bf16[2,32,4,128], index: 2, kind: input, shape index: {}]   ;;  %s1902_s3 = inlined_call_operand.hbm [shape: bf16[2,32,4,128], index: 3, kind: output, shape index: {}]  }
   0x1   :  { %1930 = sst [smem:[#allocation16_spill]] %s1899_s0 }
   0x2   :  { %8 = vsyncpa [#allocation3], 0 }
   0x3   :  { %9 = vsyncpa [#allocation6], 0 }
   0x4   :  { %10 = vsyncpa [#allocation4], 0 }
   0x5   :  { %12 = vsyncpa [#allocation4 + $0x1], 0  ;;  %s1278_s12 = smov 0   ;;  %s1280_s13 = smov 0  }
   0x6   :  { %s1282_s14 = smov 0   ;;  %s1284_s15 = smov 0  }
   0x7   :  { %s1286_s16 = smov 0   ;;  %s1288_s17 = smov 0  }
   0x8 LB: > { %s1309_s18 = sadd.s32 4294967295, %s1247_s17   ;;  %s877_s19 = sadd.s32 4294967294, %s1247_s17   ;;  %s1247_s17 = sphi %s1288_s17, %s18_s17   ;;  %s1243_s16 = sphi %s1286_s16, %s1972_s16   ;;  %s1239_s15 = sphi %s1284_s15, %s1971_s15   ;;  %s1235_s14 = sphi %s1282_s14, %s1970_s14   ;;  %s1231_s13 = sphi %s1280_s13, %s1969_s13   ;;  %s1227_s12 = sphi %s1278_s12, %s1968_s12  }
   0x9   : > { %p104_p0 = scmp.ne.s32.totalorder %s1231_s13, %s1227_s12  ;;  %p105_p1 = scmp.eq.s32.totalorder %s1309_s18, 0 }
   0xa   : > { %p130_p2 = scmp.eq.s32.totalorder %s1309_s18, 1  ;;  %p136_p3 = scmp.eq.s32.totalorder %s877_s19, 1 }
   0xb   : > { %p1318_p4 = por %p105_p1, %p104_p0  ;;  %p878_p5 = scmp.ge.s32.totalorder %s1247_s17, 1 }
   0xc   : > { %p1323_p6 = por %p136_p3, %p104_p0  ;;  %p143_p7 = scmp.lt.s32.totalorder %s1247_s17, 3 }
   0xd   : > { %s1933_s0 = sld [smem:[#allocation16_spill]]  ;;  %s1249_s26 = smov [#allocation2]  }
   0xe   : > { %p1331_p8 = pnand %p878_p5, %p143_p7  ;;  %s159_s27 = sshll.u32 %s1249_s26, 4  ;;  %s160_s27 = int_to_ptr.vmem [resolvable:$true] %s159_s27 }
   0xf   : > { %p881_p11 = scmp.ge.s32.totalorder %s1247_s17, 2  ;;  %s174_s30 = sshll.u32 %s1900_s1, 4  ;;  %s175_s30 = int_to_ptr.hbm [resolvable:$true] %s174_s30 }
  0x10   : > { %p909_p9 = pneg %p1331_p8  ;;  %s1250_s4 = smov 128  }
  0x11   : > { %s1251_s5 = smov 8   ;;  %s1252_s6 = smov [#allocation5]  }
  0x12   : > { %p910_p10 = pnand %p909_p9, %p105_p1  ;;  %s176_s7 = sshll.u32 %s1252_s6, 4  ;;  %s177_s7 = int_to_ptr.vmem [resolvable:$true] %s176_s7 }
  0x13   : > { %s157_s24 = sshll.u32 %s1933_s0, 4  ;;  %s27_s8 = sadd.s32 1, %s1243_s16  ;;  %s158_s24 = int_to_ptr.hbm [resolvable:$true] %s157_s24 }
  0x14   : > { %912 = dma.hbm_to_vmem [thread:$0]  (!%p910_p10), %s158_s24, 512, %s160_s27, [#allocation3], %s1250_s4, %s1250_s4, %s1251_s5  }
  0x15   : > { %915 = dma.hbm_to_vmem [thread:$0]  (!%p910_p10), %s175_s30, 512, %s177_s7, [#allocation6], %s1250_s4, %s1250_s4, %s1251_s5  }
  0x16   : > { %s91_s9 = sadd.s32 1, %s1235_s14  ;;  %p28_p12 = scmp.ge.s32.totalorder %s27_s8, 2 }
  0x17   : > { %p98_p13 = scmp.ne.s32.totalorder %s1235_s14, %s1231_s13  ;;  %p99_p0 = scmp.eq.s32.totalorder %s1247_s17, 0 }
  0x18   : > { %p926_p3 = scmp.lt.s32.totalorder %s1247_s17, 2  ;;  %s1974_s8 = smov (%p28_p12, %s27_s8), 0 }
  0x19   : > { %p1351_p5 = por %p99_p0, %p98_p13  ;;  %p1357_p7 = por %p130_p2, %p98_p13 }
  0x1a   : > { %s86_s19 = ssub.s32 %s1243_s16, %s1974_s8  ;;  %s190_s22 = sand.u32 1, %s1247_s17  }
  0x1b   : > { %p89_p9 = scmp.eq.s32.totalorder %s86_s19, 0  ;;  %s192_s23 = sand.u32 1, %s1235_s14  }
  0x1c   : > { %s895_s24 = sshll.u32 %s1243_s16, 6  ;;  %s882_s27 = sshll.u32 %s192_s23, 6 }
  0x1d   : > { %s1367_s26 = scalar_select %p89_p9, %s1235_s14, %s91_s9  }
  0x1e   : > { %s201_s30 = scalar_lea.hbm %s1901_s2, %s895_s24  ;;  %s194_s5 = scalar_lea.vmem [#allocation7], %s882_s27 }
  0x1f   : > { %s202_s4 = sshll.u32 %s201_s30, 4  ;;  %s204_s6 = sshll.u32 %s194_s5, 4  ;;  %s203_s4 = int_to_ptr.hbm [resolvable:$true] %s202_s4  ;;  %s205_s6 = int_to_ptr.vmem [resolvable:$true] %s204_s6 }
  0x20   : > { %p917_p2 = pnand %p926_p3, %p1351_p5  ;;  %s191_s7 = scalar_lea.sflag [#allocation3], %s190_s22 }
  0x21   : > { %s1253_s0 = smov 32   ;;  %s1254_s19 = smov 2  }
  0x22   : > { %919 = dma.hbm_to_vmem [thread:$0]  (!%p917_p2), %s203_s4, 1024, %s205_s6, %s191_s7, %s1253_s0, %s1253_s0, %s1254_s19  }
  0x23   : > { %216 = sbr.rel (%p1331_p8) target bundleno = 222 (0xde), region = 32 }
  0x28   : > { %1210 = dma.done.wait (%p105_p1), [#allocation3], 512  }
  0x29   : > { %1212 = vsyncadd (%p105_p1), [#allocation3], 4294966784 }
  0x2a   : > { %1214 = dma.done.wait (%p105_p1), [#allocation6], 512  }
  0x2b   : > { %1216 = vsyncadd (%p105_p1), [#allocation6], 4294966784  ;;  %s228_s0 = sand.u32 1, %s1309_s18   ;;  %s230_s9 = sand.u32 1, %s1231_s13  }
  0x2c   : > { %s1390_s25 = sshll.u32 %s230_s9, 6  ;;  %s229_s10 = scalar_lea.sflag [#allocation3], %s228_s0 }
  0x2d   : > { %s1393_s22 = scalar_lea.vmem [#allocation7], %s1390_s25 }
  0x2e   : > { %1218 = dma.done.wait (%p1318_p4), %s229_s10, 1024  }
  0x2f   : > { %1220 = vsyncadd (%p1318_p4), %s229_s10, 4294966272  ;;  %v1400_v0 = vld [vmem:[%s1393_s22] sm:$0x3]  ;;  %v1403_v1 = vld [vmem:[%s1393_s22 + $0x2] sm:$0x3]  ;;  %s1255_s18 = smov 64  }
  0x30   : > { %v292_v2 = vunpack.c.l.bf16 %v1400_v0  ;;  %v293_v3 = vunpack.c.l.bf16 %v1403_v1  ;;  %v1408_v4 = vld [vmem:[%s1393_s22 + $0x8] sm:$0x3]  ;;  %v1411_v5 = vld [vmem:[%s1393_s22 + $0xa] sm:$0x3]  ;;  %v1416_v8 = vld [vmem:[%s1393_s22 + $0x4] sm:$0x3] }
  0x31   : > { %v296_v6 = vunpack.c.l.bf16 %v1408_v4  ;;  %v297_v7 = vunpack.c.l.bf16 %v1411_v5  ;;  %v1419_v9 = vld [vmem:[%s1393_s22 + $0x6] sm:$0x3]  ;;  %v1426_v11 = vld [vmem:[%s1393_s22 + $0xc] sm:$0x3]  ;;  %v1429_v12 = vld [vmem:[%s1393_s22 + $0xe] sm:$0x3]  ;;  %v294_v14 = vunpack.c.l.bf16 %v1416_v8 }
  0x32   : > { %v987_v10 = vpack.i.bf16 %v293_v3, %v292_v2  ;;  %v295_v15 = vunpack.c.l.bf16 %v1419_v9  ;;  %v1924_v16 = vunpack.c.l.bf16 %v1426_v11  ;;  %v1923_v17 = vunpack.c.l.bf16 %v1429_v12  ;;  %v1442_v18 = vld [vmem:[%s1393_s22 + $0x10] sm:$0x3]  ;;  %v1445_v19 = vld [vmem:[%s1393_s22 + $0x12] sm:$0x3]  ;;  %v1454_v23 = vld [vmem:[%s1393_s22 + $0x14] sm:$0x3] }
  0x33   : > { %v997_v13 = vpack.i.bf16 %v297_v7, %v296_v6  ;;  %v300_v20 = vunpack.c.l.bf16 %v1442_v18  ;;  %v301_v21 = vunpack.c.l.bf16 %v1445_v19  ;;  %v1457_v24 = vld [vmem:[%s1393_s22 + $0x16] sm:$0x3]  ;;  %v1464_v26 = vld [vmem:[%s1393_s22 + $0x18] sm:$0x3]  ;;  %v1467_v27 = vld [vmem:[%s1393_s22 + $0x1a] sm:$0x3]  ;;  %v1926_v31 = vunpack.c.l.bf16 %v1454_v23 }
  0x34   : > { %988 = vrot.lane.b32.xlu0 %v987_v10, %s1255_s18  ;;  %v992_v22 = vpack.i.bf16 %v295_v15, %v294_v14  ;;  %v1002_v25 = vpack.i.bf16 %v1923_v17, %v1924_v16  ;;  %v1474_v29 = vld [vmem:[%s1393_s22 + $0x1c] sm:$0x3]  ;;  %v1477_v30 = vld [vmem:[%s1393_s22 + $0x1e] sm:$0x3]  ;;  %v1925_v32 = vunpack.c.l.bf16 %v1457_v24  ;;  %v1922_v33 = vunpack.c.l.bf16 %v1464_v26  ;;  %v1497_v39 = vld [vmem:[%s1393_s22 + $0x20] sm:$0x3] }
  0x35   : > { %998 = vrot.lane.b32.xlu1 %v997_v13, %s1255_s18  ;;  %v1007_v28 = vpack.i.bf16 %v301_v21, %v300_v20  ;;  %v1921_v34 = vunpack.c.l.bf16 %v1467_v27  ;;  %v1918_v35 = vunpack.c.l.bf16 %v1474_v29  ;;  %v1915_v36 = vunpack.c.l.bf16 %v1477_v30  ;;  %v1500_v40 = vld [vmem:[%s1393_s22 + $0x22] sm:$0x3]  ;;  %v1507_v42 = vld [vmem:[%s1393_s22 + $0x24] sm:$0x3]  ;;  %v1510_v43 = vld [vmem:[%s1393_s22 + $0x26] sm:$0x3] }
  0x36   : > { %v1012_v37 = vpack.i.bf16 %v1925_v32, %v1926_v31  ;;  %v1513_v44 = vld [vmem:[%s1393_s22 + $0x28] sm:$0x3]  ;;  %v1516_v45 = vld [vmem:[%s1393_s22 + $0x2a] sm:$0x3]  ;;  %v1920_v46 = vunpack.c.l.bf16 %v1497_v39  ;;  %v1919_v47 = vunpack.c.l.bf16 %v1500_v40  ;;  %v1914_v48 = vunpack.c.l.bf16 %v1507_v42  ;;  %v1536_v54 = vld [vmem:[%s1393_s22 + $0x2c] sm:$0x3] }
  0x37   : > { %1008 = vrot.lane.b32.xlu2 %v1007_v28, %s1255_s18  ;;  %v1017_v38 = vpack.i.bf16 %v1921_v34, %v1922_v33  ;;  %v1022_v41 = vpack.i.bf16 %v1915_v36, %v1918_v35  ;;  %v1911_v49 = vunpack.c.l.bf16 %v1510_v43  ;;  %v1908_v50 = vunpack.c.l.bf16 %v1513_v44  ;;  %v1539_v55 = vld [vmem:[%s1393_s22 + $0x2e] sm:$0x3]  ;;  %v1546_v57 = vld [vmem:[%s1393_s22 + $0x30] sm:$0x3]  ;;  %v1549_v58 = vld [vmem:[%s1393_s22 + $0x32] sm:$0x3] }
  0x38   : > { %v1903_v51 = vunpack.c.l.bf16 %v1516_v45  ;;  %v1027_v52 = vpack.i.bf16 %v1919_v47, %v1920_v46  ;;  %v1552_v59 = vld [vmem:[%s1393_s22 + $0x34] sm:$0x3]  ;;  %v1555_v60 = vld [vmem:[%s1393_s22 + $0x36] sm:$0x3]  ;;  %v1910_v61 = vunpack.c.l.bf16 %v1536_v54  ;;  %v1909_v62 = vunpack.c.l.bf16 %v1539_v55  ;;  %s1692_s20 = scalar_lea.vmem [#allocation8], %s1390_s25  ;;  %s896_s23 = sshll.u32 %s1239_s15, 6 }
  0x39   : > { %v1032_v53 = vpack.i.bf16 %v1911_v49, %v1914_v48  ;;  %1937 = vst [vmem:[#allocation13_spill] sm:$0xff] %v1555_v60  ;;  %v1905_v63 = vunpack.c.l.bf16 %v1546_v57  ;;  %v1904_v10 = vunpack.c.l.bf16 %v1549_v58  ;;  %v1907_v13 = vunpack.c.l.bf16 %v1552_v59  ;;  %v1610_v49 = vld [vmem:[#allocation5] sm:$0xff]  ;;  %s762_s27 = scalar_lea.hbm %s1902_s3, %s896_s23  ;;  %s763_s28 = sshll.u32 %s1692_s20, 4  ;;  %s764_s28 = int_to_ptr.vmem [resolvable:$true] %s763_s28 }
  0x3a   : > { %v1037_v56 = vpack.i.bf16 %v1903_v51, %v1908_v50  ;;  %v432_v35 = vrot.slane %v1610_v49, 1  ;;  %v435_v34 = vrot.slane %v1610_v49, 4  ;;  %v436_v33 = vrot.slane %v1610_v49, 5  ;;  %s765_s29 = sshll.u32 %s762_s27, 4  ;;  %s749_s30 = scalar_lea.sflag [#allocation4], %s230_s9  ;;  %s766_s29 = int_to_ptr.hbm [resolvable:$true] %s765_s29 }
  0x3b   : > { %v1047_v28 = vpack.i.bf16 %v1904_v10, %v1905_v63  ;;  %v433_v17 = vrot.slane %v1610_v49, 2  ;;  %v434_v16 = vrot.slane %v1610_v49, 3  ;;  %s1171_s4 = sshra.s32 %s766_s29, 4  ;;  %s1177_s19 = scalar_lea.hbm %s1902_s3, 128  ;;  %s1172_s4 = int_to_ptr.hbm [resolvable:$true] %s1171_s4 }
  0x3c   : > { %993 = vrot.lane.b32.xlu0 %v992_v22, %s1255_s18  ;;  %v1906_v22 = vunpack.c.l.bf16 %v1555_v60  ;;  %v1645_v5 = vperm.slane %v435_v34, 0  ;;  %s1173_s5 = scalar_lea.hbm %s1172_s4, 64  ;;  %p1178_p10 = scmp.lt.s32.totalorder %s1172_s4, %s1902_s3 }
  0x3d   : > { %1003 = vrot.lane.b32.xlu1 %v1002_v25, %s1255_s18  ;;  %v1042_v25 = vpack.i.bf16 %v1909_v62, %v1910_v61  ;;  %v1657_v19 = vperm.slane %v433_v17, 0  ;;  %p1174_p1 = scmp.ne.s32.totalorder %s1172_s4, %s1173_s5  ;;  %p1179_p12 = scmp.lt.s32.totalorder %s1177_s19, %s1173_s5 }
  0x3f   : > { %1013 = vrot.lane.b32.xlu2 %v1012_v37, %s1255_s18  ;;  %v1575_v37 = vld [vmem:[%s1393_s22 + $0x38] sm:$0x3]  ;;  %p1175_p4 = pnand %p1174_p1, %p1357_p7  ;;  %p1180_p13 = por %p1179_p12, %p1178_p10 }
  0x41   : > { %p1176_p8 = pneg %p1175_p4 }
  0x43   : > { %p1181_p0 = pnand %p1180_p13, %p1176_p8 }
  0x44   : > { %1018 = vrot.lane.b32.xlu0 %v1017_v38, %s1255_s18  ;;  %v1578_v38 = vld [vmem:[%s1393_s22 + $0x3a] sm:$0x3] }
  0x45   : > { %1023 = vrot.lane.b32.xlu1 %v1022_v41, %s1255_s18  ;;  %v1052_v41 = vpack.i.bf16 %v1906_v22, %v1907_v13  ;;  %v1912_v51 = vunpack.c.l.bf16 %v1578_v38  ;;  %v1607_v13 = vld [vmem:[#allocation2 + $0x8] sm:$0xff] }
  0x46   : > { %v403_v61 = vrot.slane %v1607_v13, 1  ;;  %v404_v34 = vrot.slane %v1607_v13, 2 }
  0x47   : > { %1028 = vrot.lane.b32.xlu2 %v1027_v52, %s1255_s18  ;;  %v1585_v52 = vld [vmem:[%s1393_s22 + $0x3c] sm:$0x3] }
  0x48   : > { %1938 = vst [vmem:[#allocation14_spill] sm:$0xff] %v1585_v52  ;;  %v1917_v10 = vunpack.c.l.bf16 %v1585_v52 }
  0x4c   : > { %1033 = vrot.lane.b32.xlu0 %v1032_v53, %s1255_s18  ;;  %v1588_v53 = vld [vmem:[%s1393_s22 + $0x3e] sm:$0x3] }
  0x4d   : > { %1038 = vrot.lane.b32.xlu1 %v1037_v56, %s1255_s18  ;;  %1939 = vst [vmem:[#allocation15_spill] sm:$0xff] %v1588_v53  ;;  %v1913_v56 = vunpack.c.l.bf16 %v1575_v37  ;;  %v1916_v63 = vunpack.c.l.bf16 %v1588_v53 }
  0x4f   : > { %1043 = vrot.lane.b32.xlu2 %v1042_v25, %s1255_s18  ;;  %v1057_v22 = vpack.i.bf16 %v1912_v51, %v1913_v56  ;;  %v1062_v25 = vpack.i.bf16 %v1916_v63, %v1917_v10  ;;  %v1612_v56 = vld [vmem:[#allocation5 + $0x8] sm:$0xff] }
  0x50   : > { %v439_v46 = vrot.slane %v1612_v56, 1  ;;  %v564_v0 = vperm.slane %v1612_v56, 0  ;;  %v441_v8 = vrot.slane %v1612_v56, 3 }
  0x54   : > { %1048 = vrot.lane.b32.xlu0 %v1047_v28, %s1255_s18  ;;  %v388_v28 = vld [vmem:[#allocation2] sm:$0xff] }
  0x55   : > { %1053 = vrot.lane.b32.xlu1 %v1052_v41, %s1255_s18  ;;  %v396_v50 = vrot.slane %v388_v28, 1  ;;  %v399_v62 = vrot.slane %v388_v28, 4  ;;  %v400_v41 = vrot.slane %v388_v28, 5  ;;  %v460_v51 = vperm.slane %v388_v28, 0 }
  0x56   : > { %v397_v10 = vrot.slane %v388_v28, 2  ;;  %v398_v47 = vrot.slane %v388_v28, 3 }
  0x57   : > { %1058 = vrot.lane.b32.xlu2 %v1057_v22, %s1255_s18  ;;  %v461_v48 = vperm.slane %v396_v50, 0  ;;  %v464_v36 = vperm.slane %v399_v62, 0  ;;  %v465_v63 = vperm.slane %v400_v41, 0  ;;  %v468_v22 = vperm.slane %v1607_v13, 0 }
  0x58   : > { %v462_v50 = vperm.slane %v397_v10, 0  ;;  %v463_v62 = vperm.slane %v398_v47, 0  ;;  %v1642_v47 = vperm.slane %v432_v35, 0 }
  0x59   : > { %v1623_v41 = vmul.f32 %v461_v48, %v293_v3  ;;  %v1631_v32 = vmul.f32 %v465_v63, %v297_v7  ;;  %v1635_v31 = vmul.f32 %v464_v36, %v296_v6  ;;  %v532_v1 = vmul.f32 %v468_v22, %v300_v20 }
  0x5a   : > { %v1647_v7 = vperm.slane %v436_v33, 0  ;;  %v1651_v6 = vmul.f32 %v462_v50, %v294_v14  ;;  %v1655_v18 = vmul.f32 %v463_v62, %v295_v15  ;;  %v1659_v20 = vperm.slane %v434_v16, 0 }
  0x5b   : > { %v405_v33 = vrot.slane %v1607_v13, 3  ;;  %v440_v36 = vrot.slane %v1612_v56, 2  ;;  %v401_v14 = vrot.slane %v388_v28, 6  ;;  %v470_v15 = vperm.slane %v404_v34, 0 }
  0x5c   : > { %1063 = vrot.lane.b32.xlu0 %v1062_v25, %s1255_s18  ;;  %v469_v25 = vperm.slane %v403_v61, 0  ;;  %v1627_v61 = vmul.f32 %v460_v51, %v292_v2  ;;  %v565_v2 = vperm.slane %v439_v46, 0  ;;  %v402_v46 = vrot.slane %v388_v28, 7 }
  0x5d   : > { %v471_v51 = vperm.slane %v405_v33, 0  ;;  %v566_v17 = vperm.slane %v440_v36, 0  ;;  %v567_v63 = vperm.slane %v441_v8, 0  ;;  %v437_v16 = vrot.slane %v1610_v49, 6 }
  0x5e   : > { %v533_v10 = vmul.f32 %v469_v25, %v301_v21  ;;  %v438_v22 = vrot.slane %v1610_v49, 7  ;;  %v1940_v62 = vunpack.c.l.bf16 %v1454_v23  ;;  %v1941_v3 = vunpack.c.l.bf16 %v1457_v24 }
  0x5f   : > { %v466_v28 = vperm.slane %v401_v14, 0  ;;  %v406_v33 = vrot.slane %v1607_v13, 4  ;;  %v1942_v23 = vunpack.c.l.bf16 %v1426_v11  ;;  %v1943_v24 = vunpack.c.l.bf16 %v1429_v12 }
  0x60   : > { %v535_v53 = vmul.f32 %v471_v51, %v1941_v3  ;;  %v442_v8 = vrot.slane %v1612_v56, 4  ;;  %v443_v14 = vrot.slane %v1612_v56, 5 }
  0x61   : > { %v1679_v36 = vmul.f32 %v466_v28, %v1942_v23  ;;  %v1944_v28 = vunpack.c.l.bf16 %v1464_v26  ;;  %v1946_v26 = vunpack.c.l.bf16 %v1497_v39 }
  0x62   : > { %v1696_v12 = vperm.slane %v442_v8, 0 }
  0x91   : > { %v1009_v4 = vpop.permute.xlu2 %1008 }
  0x92   : > { %v1011_v21 = vunpack.i.h.bf16 %v1009_v4  ;;  %v1010_v35 = vunpack.i.l.bf16 %v1009_v4  ;;  %v534_v4 = vmul.f32 %v470_v15, %v1940_v62  ;;  %v472_v15 = vperm.slane %v406_v33, 0 }
  0x94   : > { %v629_v48 = vmul.f32 %v1011_v21, %v565_v2  ;;  %v628_v9 = vmul.f32 %v1010_v35, %v564_v0  ;;  %v467_v2 = vperm.slane %v402_v46, 0  ;;  %v1671_v0 = vperm.slane %v437_v16, 0  ;;  %v1687_v46 = vld [vmem:[#allocation2 + $0x10] sm:$0xff] }
  0x95   : > { %v1673_v21 = vperm.slane %v438_v22, 0  ;;  %v1698_v16 = vperm.slane %v443_v14, 0  ;;  %v410_v22 = vrot.slane %v1687_v46, 1  ;;  %v408_v14 = vrot.slane %v1607_v13, 6 }
  0x96   : > { %v661_v25 = vadd.f32 %v629_v48, %v533_v10  ;;  %v660_v50 = vadd.f32 %v628_v9, %v532_v1  ;;  %v407_v10 = vrot.slane %v1607_v13, 5  ;;  %v1683_v3 = vmul.f32 %v467_v2, %v1943_v24  ;;  %v1689_v48 = vld [vmem:[#allocation5 + $0x10] sm:$0xff] }
  0x97   : > { %v1704_v2 = vmul.f32 %v472_v15, %v1944_v28  ;;  %v477_v33 = vperm.slane %v410_v22, 0  ;;  %v445_v15 = vrot.slane %v1612_v56, 7  ;;  %v411_v39 = vrot.slane %v1687_v46, 2 }
  0x98   : > { %v693_v35 = vpack.c.bf16 %v661_v25, %v661_v25  ;;  %v692_v34 = vpack.c.bf16 %v660_v50, %v660_v50  ;;  %v473_v51 = vperm.slane %v407_v10, 0  ;;  %v446_v25 = vrot.slane %v1689_v48, 1 }
  0x99   : > { %v1014_v1 = vpop.permute.xlu2 %1013  ;;  %v572_v10 = vperm.slane %v1689_v48, 0 }
  0x9a   : > { %725 = vst [vmem:[%s1692_s20 + $0x12] sm:$0x3] %v693_v35  ;;  %v1016_v11 = vunpack.i.h.bf16 %v1014_v1  ;;  %v1015_v9 = vunpack.i.l.bf16 %v1014_v1  ;;  %v1945_v35 = vunpack.c.l.bf16 %v1467_v27  ;;  %v573_v23 = vperm.slane %v446_v25, 0 }
  0x9b   : > { %724 = vst [vmem:[%s1692_s20 + $0x10] sm:$0x3] %v692_v34  ;;  %v476_v34 = vperm.slane %v1687_v46, 0  ;;  %v1947_v27 = vunpack.c.l.bf16 %v1500_v40  ;;  %v474_v25 = vperm.slane %v408_v14, 0 }
  0x9c   : > { %v631_v50 = vmul.f32 %v1016_v11, %v567_v63  ;;  %v630_v62 = vmul.f32 %v1015_v9, %v566_v17  ;;  %v1708_v1 = vmul.f32 %v473_v51, %v1945_v35  ;;  %v409_v17 = vrot.slane %v1607_v13, 7 }
  0x9d   : > { %v540_v63 = vmul.f32 %v476_v34, %v1946_v26  ;;  %v541_v11 = vmul.f32 %v477_v33, %v1947_v27  ;;  %v444_v9 = vrot.slane %v1612_v56, 6  ;;  %v412_v13 = vrot.slane %v1687_v46, 3 }
  0x9e   : > { %v663_v24 = vadd.f32 %v631_v50, %v535_v53  ;;  %v662_v8 = vadd.f32 %v630_v62, %v534_v4  ;;  %v475_v53 = vperm.slane %v409_v17, 0  ;;  %v1722_v62 = vperm.slane %v445_v15, 0 }
  0x9f   : > { %v1720_v50 = vperm.slane %v444_v9, 0  ;;  %v1948_v56 = vunpack.c.l.bf16 %v1474_v29  ;;  %v1949_v33 = vunpack.c.l.bf16 %v1477_v30  ;;  %v447_v26 = vrot.slane %v1689_v48, 2 }
  0xa0   : > { %v695_v51 = vpack.c.bf16 %v663_v24, %v663_v24  ;;  %v694_v22 = vpack.c.bf16 %v662_v8, %v662_v8  ;;  %v448_v27 = vrot.slane %v1689_v48, 3  ;;  %v478_v30 = vperm.slane %v411_v39, 0 }
  0xa1   : > { %v1029_v4 = vpop.permute.xlu2 %1028  ;;  %v1729_v34 = vmul.f32 %v474_v25, %v1948_v56  ;;  %v1733_v24 = vmul.f32 %v475_v53, %v1949_v33  ;;  %v1950_v25 = vperm.slane %v1610_v49, 0  ;;  %v479_v53 = vperm.slane %v412_v13, 0 }
  0xa2   : > { %727 = vst [vmem:[%s1692_s20 + $0x16] sm:$0x3] %v695_v51  ;;  %v1031_v28 = vunpack.i.h.bf16 %v1029_v4  ;;  %v1030_v35 = vunpack.i.l.bf16 %v1029_v4  ;;  %v1952_v49 = vunpack.c.l.bf16 %v1510_v43  ;;  %v1755_v13 = vperm.slane %v447_v26, 0 }
  0xa3   : > { %726 = vst [vmem:[%s1692_s20 + $0x14] sm:$0x3] %v694_v22  ;;  %v415_v43 = vrot.slane %v1687_v46, 6 }
  0xa4   : > { %v637_v51 = vmul.f32 %v1031_v28, %v573_v23  ;;  %v636_v4 = vmul.f32 %v1030_v35, %v572_v10  ;;  %v1951_v10 = vunpack.c.l.bf16 %v1507_v42 }
  0xa6   : > { %v989_v40 = vpop.permute.xlu0 %988  ;;  %v669_v22 = vadd.f32 %v637_v51, %v541_v11  ;;  %v668_v52 = vadd.f32 %v636_v4, %v540_v63  ;;  %v1747_v23 = vmul.f32 %v478_v30, %v1951_v10 }
  0xa7   : > { %v991_v8 = vunpack.i.h.bf16 %v989_v40  ;;  %v990_v14 = vunpack.i.l.bf16 %v989_v40  ;;  %v999_v17 = vpop.permute.xlu1 %998 }
  0xa8   : > { %v1001_v9 = vunpack.i.h.bf16 %v999_v17  ;;  %v1000_v15 = vunpack.i.l.bf16 %v999_v17  ;;  %v701_v11 = vpack.c.bf16 %v669_v22, %v669_v22  ;;  %v700_v63 = vpack.c.bf16 %v668_v52, %v668_v52 }
  0xa9   : > { %v621_v29 = vmul.f32 %v991_v8, %v1642_v47  ;;  %v620_v56 = vmul.f32 %v990_v14, %v1950_v25  ;;  %v1751_v47 = vmul.f32 %v479_v53, %v1952_v49  ;;  %v451_v8 = vrot.slane %v1689_v48, 6  ;;  %v1044_v51 = vpop.permute.xlu2 %1043 }
  0xaa   : > { %v625_v33 = vmul.f32 %v1001_v9, %v1647_v7  ;;  %v624_v40 = vmul.f32 %v1000_v15, %v1645_v5  ;;  %733 = vst [vmem:[%s1692_s20 + $0x22] sm:$0x3] %v701_v11  ;;  %v452_v14 = vrot.slane %v1689_v48, 7  ;;  %v482_v9 = vperm.slane %v415_v43, 0 }
  0xab   : > { %v653_v60 = vadd.f32 %v621_v29, %v1623_v41  ;;  %v652_v17 = vadd.f32 %v620_v56, %v1627_v61  ;;  %v1757_v61 = vperm.slane %v448_v27, 0  ;;  %v578_v25 = vperm.slane %v451_v8, 0  ;;  %732 = vst [vmem:[%s1692_s20 + $0x20] sm:$0x3] %v700_v63 }
  0xac   : > { %v657_v7 = vadd.f32 %v625_v33, %v1631_v32  ;;  %v656_v5 = vadd.f32 %v624_v40, %v1635_v31  ;;  %v416_v32 = vrot.slane %v1687_v46, 7  ;;  %v579_v56 = vperm.slane %v452_v14, 0 }
  0xad   : > { %v685_v39 = vpack.c.bf16 %v653_v60, %v653_v60  ;;  %v684_v41 = vpack.c.bf16 %v652_v17, %v652_v17  ;;  %v1953_v33 = vunpack.c.l.bf16 %v1536_v54  ;;  %v1954_v22 = vunpack.c.l.bf16 %v1539_v55 }
  0xae   : > { %v689_v42 = vpack.c.bf16 %v657_v7, %v657_v7  ;;  %v688_v28 = vpack.c.bf16 %v656_v5, %v656_v5  ;;  %v994_v35 = vpop.permute.xlu0 %993  ;;  %v483_v15 = vperm.slane %v416_v32, 0  ;;  %v414_v54 = vrot.slane %v1687_v46, 5 }
  0xaf   : > { %717 = vst [vmem:[%s1692_s20 + $0x2] sm:$0x3] %v685_v39  ;;  %v996_v31 = vunpack.i.h.bf16 %v994_v35  ;;  %v995_v52 = vunpack.i.l.bf16 %v994_v35  ;;  %v1004_v60 = vpop.permute.xlu1 %1003  ;;  %v546_v40 = vmul.f32 %v482_v9, %v1953_v33 }
  0xb0   : > { %716 = vst [vmem:[%s1692_s20] sm:$0x3] %v684_v41  ;;  %v1006_v26 = vunpack.i.h.bf16 %v1004_v60  ;;  %v1005_v27 = vunpack.i.l.bf16 %v1004_v60  ;;  %v547_v17 = vmul.f32 %v483_v15, %v1954_v22  ;;  %v449_v41 = vrot.slane %v1689_v48, 4 }
  0xb1   : > { %721 = vst [vmem:[%s1692_s20 + $0xa] sm:$0x3] %v689_v42  ;;  %v623_v4 = vmul.f32 %v996_v31, %v1659_v20  ;;  %v622_v29 = vmul.f32 %v995_v52, %v1657_v19  ;;  %v1046_v19 = vunpack.i.h.bf16 %v1044_v51  ;;  %v1045_v20 = vunpack.i.l.bf16 %v1044_v51 }
  0xb2   : > { %720 = vst [vmem:[%s1692_s20 + $0x8] sm:$0x3] %v688_v28  ;;  %v627_v30 = vmul.f32 %v1006_v26, %v1673_v21  ;;  %v626_v53 = vmul.f32 %v1005_v27, %v1671_v0  ;;  %v413_v0 = vrot.slane %v1687_v46, 4  ;;  %v450_v42 = vrot.slane %v1689_v48, 5  ;;  %v1790_v26 = vld [vmem:[#allocation2 + $0x18] sm:$0xff] }
  0xb3   : > { %v655_v10 = vadd.f32 %v623_v4, %v1655_v18  ;;  %v654_v49 = vadd.f32 %v622_v29, %v1651_v6  ;;  %v643_v11 = vmul.f32 %v1046_v19, %v579_v56  ;;  %v642_v39 = vmul.f32 %v1045_v20, %v578_v25  ;;  %v1792_v27 = vld [vmem:[#allocation5 + $0x18] sm:$0xff] }
  0xb4   : > { %v659_v7 = vadd.f32 %v627_v30, %v1683_v3  ;;  %v658_v21 = vadd.f32 %v626_v53, %v1679_v36  ;;  %v480_v31 = vperm.slane %v413_v0, 0  ;;  %v481_v52 = vperm.slane %v414_v54, 0 }
  0xb5   : > { %v687_v5 = vpack.c.bf16 %v655_v10, %v655_v10  ;;  %v686_v55 = vpack.c.bf16 %v654_v49, %v654_v49  ;;  %v675_v35 = vadd.f32 %v643_v11, %v547_v17  ;;  %v674_v46 = vadd.f32 %v642_v39, %v546_v40 }
  0xb6   : > { %v691_v18 = vpack.c.bf16 %v659_v7, %v659_v7  ;;  %v690_v6 = vpack.c.bf16 %v658_v21, %v658_v21  ;;  %v1019_v63 = vpop.permute.xlu0 %1018  ;;  %v1955_v51 = vunpack.c.l.bf16 %v1513_v44  ;;  %v1956_v29 = vunpack.c.l.bf16 %v1516_v45 }
  0xb7   : > { %719 = vst [vmem:[%s1692_s20 + $0x6] sm:$0x3] %v687_v5  ;;  %v1021_v3 = vunpack.i.h.bf16 %v1019_v63  ;;  %v1020_v36 = vunpack.i.l.bf16 %v1019_v63  ;;  %v1024_v28 = vpop.permute.xlu1 %1023  ;;  %v707_v14 = vpack.c.bf16 %v675_v35, %v675_v35  ;;  %v706_v48 = vpack.c.bf16 %v674_v46, %v674_v46 }
  0xb8   : > { %718 = vst [vmem:[%s1692_s20 + $0x4] sm:$0x3] %v686_v55  ;;  %v1026_v43 = vunpack.i.h.bf16 %v1024_v28  ;;  %v1025_v32 = vunpack.i.l.bf16 %v1024_v28  ;;  %v544_v4 = vmul.f32 %v480_v31, %v1955_v51  ;;  %v576_v56 = vperm.slane %v449_v41, 0 }
  0xb9   : > { %723 = vst [vmem:[%s1692_s20 + $0xe] sm:$0x3] %v691_v18  ;;  %v633_v60 = vmul.f32 %v1021_v3, %v1698_v16  ;;  %v632_v8 = vmul.f32 %v1020_v36, %v1696_v12  ;;  %v545_v16 = vmul.f32 %v481_v52, %v1956_v29  ;;  %v577_v30 = vperm.slane %v450_v42, 0  ;;  %v1059_v36 = vpop.permute.xlu2 %1058 }
  0xba   : > { %722 = vst [vmem:[%s1692_s20 + $0xc] sm:$0x3] %v690_v6  ;;  %v635_v9 = vmul.f32 %v1026_v43, %v1722_v62  ;;  %v634_v15 = vmul.f32 %v1025_v32, %v1720_v50  ;;  %v417_v50 = vrot.slane %v1790_v26, 1  ;;  %v453_v44 = vrot.slane %v1792_v27, 1 }
  0xbb   : > { %v665_v12 = vadd.f32 %v633_v60, %v1708_v1  ;;  %v664_v25 = vadd.f32 %v632_v8, %v1704_v2  ;;  %739 = vst [vmem:[%s1692_s20 + $0x2e] sm:$0x3] %v707_v14  ;;  %v484_v1 = vperm.slane %v1790_v26, 0  ;;  %v580_v2 = vperm.slane %v1792_v27, 0 }
  0xbc   : > { %v667_v53 = vadd.f32 %v635_v9, %v1733_v24  ;;  %v666_v62 = vadd.f32 %v634_v15, %v1729_v34  ;;  %738 = vst [vmem:[%s1692_s20 + $0x2c] sm:$0x3] %v706_v48  ;;  %v485_v10 = vperm.slane %v417_v50, 0  ;;  %v581_v24 = vperm.slane %v453_v44, 0 }
  0xbd   : > { %v697_v45 = vpack.c.bf16 %v665_v12, %v665_v12  ;;  %v696_v33 = vpack.c.bf16 %v664_v25, %v664_v25  ;;  %v1957_v20 = vunpack.c.l.bf16 %v1546_v57  ;;  %v420_v21 = vrot.slane %v1790_v26, 4 }
  0xbe   : > { %v699_v40 = vpack.c.bf16 %v667_v53, %v667_v53  ;;  %v698_v22 = vpack.c.bf16 %v666_v62, %v666_v62  ;;  %v1034_v17 = vpop.permute.xlu0 %1033  ;;  %v1958_v5 = vunpack.c.l.bf16 %v1549_v58  ;;  %v421_v11 = vrot.slane %v1790_v26, 5 }
  0xbf   : > { %729 = vst [vmem:[%s1692_s20 + $0x1a] sm:$0x3] %v697_v45  ;;  %v1036_v34 = vunpack.i.h.bf16 %v1034_v17  ;;  %v1035_v49 = vunpack.i.l.bf16 %v1034_v17  ;;  %v1039_v19 = vpop.permute.xlu1 %1038  ;;  %v548_v7 = vmul.f32 %v484_v1, %v1957_v20  ;;  %v456_v6 = vrot.slane %v1792_v27, 4  ;;  %v1962_v1 = vld [vmem:[#allocation13_spill] sm:$0xff] }
  0xc0   : > { %728 = vst [vmem:[%s1692_s20 + $0x18] sm:$0x3] %v696_v33  ;;  %v1041_v0 = vunpack.i.h.bf16 %v1039_v19  ;;  %v1040_v54 = vunpack.i.l.bf16 %v1039_v19  ;;  %v549_v55 = vmul.f32 %v485_v10, %v1958_v5  ;;  %v457_v57 = vrot.slane %v1792_v27, 5 }
  0xc1   : > { %731 = vst [vmem:[%s1692_s20 + $0x1e] sm:$0x3] %v699_v40  ;;  %v639_v39 = vmul.f32 %v1036_v34, %v1757_v61  ;;  %v638_v18 = vmul.f32 %v1035_v49, %v1755_v13  ;;  %v488_v42 = vperm.slane %v420_v21, 0  ;;  %v489_v3 = vperm.slane %v421_v11, 0 }
  0xc2   : > { %730 = vst [vmem:[%s1692_s20 + $0x1c] sm:$0x3] %v698_v22  ;;  %v641_v63 = vmul.f32 %v1041_v0, %v577_v30  ;;  %v640_v41 = vmul.f32 %v1040_v54, %v576_v56  ;;  %v584_v35 = vperm.slane %v456_v6, 0  ;;  %v585_v46 = vperm.slane %v457_v57, 0 }
  0xc3   : > { %v671_v58 = vadd.f32 %v639_v39, %v1751_v47  ;;  %v670_v28 = vadd.f32 %v638_v18, %v1747_v23  ;;  %v1959_v13 = vunpack.c.l.bf16 %v1575_v37  ;;  %v1960_v31 = vunpack.c.l.bf16 %v1578_v38 }
  0xc4   : > { %v673_v61 = vadd.f32 %v641_v63, %v545_v16  ;;  %v672_v43 = vadd.f32 %v640_v41, %v544_v4  ;;  %v1061_v14 = vunpack.i.h.bf16 %v1059_v36  ;;  %v1060_v48 = vunpack.i.l.bf16 %v1059_v36 }
  0xc5   : > { %v552_v32 = vmul.f32 %v488_v42, %v1959_v13  ;;  %v553_v52 = vmul.f32 %v489_v3, %v1960_v31  ;;  %v703_v60 = vpack.c.bf16 %v671_v58, %v671_v58  ;;  %v702_v8 = vpack.c.bf16 %v670_v28, %v670_v28  ;;  %v1964_v3 = vld [vmem:[#allocation14_spill] sm:$0xff]  ;;  %v1966_v28 = vld [vmem:[#allocation15_spill] sm:$0xff] }
  0xc6   : > { %v705_v47 = vpack.c.bf16 %v673_v61, %v673_v61  ;;  %v704_v9 = vpack.c.bf16 %v672_v43, %v672_v43  ;;  %v1049_v23 = vpop.permute.xlu0 %1048  ;;  %v418_v15 = vrot.slane %v1790_v26, 2  ;;  %v419_v51 = vrot.slane %v1790_v26, 3 }
  0xc7   : > { %735 = vst [vmem:[%s1692_s20 + $0x26] sm:$0x3] %v703_v60  ;;  %v1051_v37 = vunpack.i.h.bf16 %v1049_v23  ;;  %v1050_v4 = vunpack.i.l.bf16 %v1049_v23  ;;  %v649_v29 = vmul.f32 %v1061_v14, %v585_v46  ;;  %v648_v38 = vmul.f32 %v1060_v48, %v584_v35  ;;  %v1054_v44 = vpop.permute.xlu1 %1053 }
  0xc8   : > { %734 = vst [vmem:[%s1692_s20 + $0x24] sm:$0x3] %v702_v8  ;;  %v454_v16 = vrot.slane %v1792_v27, 2  ;;  %v455_v12 = vrot.slane %v1792_v27, 3  ;;  %v486_v25 = vperm.slane %v418_v15, 0  ;;  %v487_v56 = vperm.slane %v419_v51, 0 }
  0xc9   : > { %737 = vst [vmem:[%s1692_s20 + $0x2a] sm:$0x3] %v705_v47  ;;  %v645_v30 = vmul.f32 %v1051_v37, %v581_v24  ;;  %v644_v53 = vmul.f32 %v1050_v4, %v580_v2  ;;  %v681_v62 = vadd.f32 %v649_v29, %v553_v52  ;;  %v680_v50 = vadd.f32 %v648_v38, %v552_v32 }
  0xca   : > { %736 = vst [vmem:[%s1692_s20 + $0x28] sm:$0x3] %v704_v9  ;;  %v1961_v45 = vunpack.c.l.bf16 %v1552_v59  ;;  %v1963_v40 = vunpack.c.l.bf16 %v1962_v1  ;;  %v582_v17 = vperm.slane %v454_v16, 0  ;;  %v583_v10 = vperm.slane %v455_v12, 0 }
  0xcb   : > { %v677_v34 = vadd.f32 %v645_v30, %v549_v55  ;;  %v676_v49 = vadd.f32 %v644_v53, %v548_v7  ;;  %v713_v19 = vpack.c.bf16 %v681_v62, %v681_v62  ;;  %v712_v24 = vpack.c.bf16 %v680_v50, %v680_v50 }
  0xcc   : > { %v550_v33 = vmul.f32 %v486_v25, %v1961_v45  ;;  %v551_v22 = vmul.f32 %v487_v56, %v1963_v40  ;;  %v1056_v2 = vunpack.i.h.bf16 %v1054_v44  ;;  %v1055_v20 = vunpack.i.l.bf16 %v1054_v44 }
  0xcd   : > { %v422_v21 = vrot.slane %v1790_v26, 6  ;;  %v423_v0 = vrot.slane %v1790_v26, 7  ;;  %v709_v59 = vpack.c.bf16 %v677_v34, %v677_v34  ;;  %v708_v54 = vpack.c.bf16 %v676_v49, %v676_v49  ;;  %745 = vst [vmem:[%s1692_s20 + $0x3a] sm:$0x3] %v713_v19 }
  0xce   : > { %v458_v5 = vrot.slane %v1792_v27, 6  ;;  %v459_v11 = vrot.slane %v1792_v27, 7  ;;  %744 = vst [vmem:[%s1692_s20 + $0x38] sm:$0x3] %v712_v24  ;;  %v647_v7 = vmul.f32 %v1056_v2, %v583_v10  ;;  %v646_v55 = vmul.f32 %v1055_v20, %v582_v17  ;;  %v1064_v6 = vpop.permute.xlu0 %1063 }
  0xcf   : > { %v490_v39 = vperm.slane %v422_v21, 0  ;;  %v491_v18 = vperm.slane %v423_v0, 0  ;;  %741 = vst [vmem:[%s1692_s20 + $0x32] sm:$0x3] %v709_v59  ;;  %v1066_v26 = vunpack.i.h.bf16 %v1064_v6  ;;  %v1065_v41 = vunpack.i.l.bf16 %v1064_v6 }
  0xd0   : > { %v586_v57 = vperm.slane %v458_v5, 0  ;;  %v587_v63 = vperm.slane %v459_v11, 0  ;;  %740 = vst [vmem:[%s1692_s20 + $0x30] sm:$0x3] %v708_v54  ;;  %v679_v27 = vadd.f32 %v647_v7, %v551_v22  ;;  %v678_v42 = vadd.f32 %v646_v55, %v550_v33 }
  0xd1   : > { %v1965_v36 = vunpack.c.l.bf16 %v1964_v3  ;;  %v1967_v35 = vunpack.c.l.bf16 %v1966_v28 }
  0xd2   : > { %v651_v61 = vmul.f32 %v1066_v26, %v587_v63  ;;  %v650_v43 = vmul.f32 %v1065_v41, %v586_v57  ;;  %v711_v13 = vpack.c.bf16 %v679_v27, %v679_v27  ;;  %v710_v32 = vpack.c.bf16 %v678_v42, %v678_v42 }
  0xd3   : > { %v554_v58 = vmul.f32 %v490_v39, %v1965_v36  ;;  %v555_v46 = vmul.f32 %v491_v18, %v1967_v35 }
  0xd4   : > { %743 = vst [vmem:[%s1692_s20 + $0x36] sm:$0x3] %v711_v13 }
  0xd5   : > { %v683_v31 = vadd.f32 %v651_v61, %v555_v46  ;;  %v682_v52 = vadd.f32 %v650_v43, %v554_v58  ;;  %742 = vst [vmem:[%s1692_s20 + $0x34] sm:$0x3] %v710_v32 }
  0xd7   : > { %v715_v60 = vpack.c.bf16 %v683_v31, %v683_v31  ;;  %v714_v8 = vpack.c.bf16 %v682_v52, %v682_v52 }
  0xd9   : > { %747 = vst [vmem:[%s1692_s20 + $0x3e] sm:$0x3] %v715_v60 }
  0xda   : > { %746 = vst [vmem:[%s1692_s20 + $0x3c] sm:$0x3] %v714_v8 }
  0xdb   : > { %1184 = shalt.err (!%p1181_p0)
}
  0xdc   : > { %s1256_s9 = smov 32   ;;  %s1257_s10 = smov 2  }
  0xdd   : > { %907 = dma.vmem_to_hbm [thread:$0]  (%p1357_p7), %s764_s28, 1024, %s766_s29, %s749_s30, %s1256_s9, %s1256_s9, %s1257_s10  }
  0xde PF: > { %s780_s22 = sand.u32 1, %s1227_s12   ;;  %p921_p3 = pnand %p881_p11, %p1323_p6 }
  0xdf   : > { %s781_s18 = scalar_lea.sflag [#allocation4], %s780_s22 }
  0xe0   : > { %p922_p5 = pneg %p921_p3 }
  0xe2   : > { %1222 = dma.done.wait (%p922_p5), %s781_s18, 1024  }
  0xe3   : > { %1224 = vsyncadd (%p922_p5), %s781_s18, 4294966272  ;;  %s18_s17 = sadd.s32 1, %s1247_s17   ;;  %s1968_s12 = smov %s1231_s13 }
  0xe4   : > { %p15_p9 = scmp.ge.s32.totalorder %s18_s17, 4   ;;  %s1969_s13 = smov %s1235_s14 }
  0xe5   : > { %s1970_s14 = smov %s1367_s26  ;;  %s1971_s15 = smov %s1243_s16 }
  0xe6   : > { %s1972_s16 = smov %s1974_s8  ;;  %17 = sbr.rel (!%p15_p9) target bundleno = 8 (0x8), region = 86 }
  0xeb   :  { %787 = vsyncpa [#allocation3], 1 }
  0xec   :  { %789 = vsyncpa [#allocation3 + $0x1], 1 }
  0xed   :  { %790 = vsyncpa [#allocation6], 1 }
  0xee   :  { %791 = vsyncpa [#allocation4], 1 }
  0xef   :  { %793 = vsyncpa [#allocation4 + $0x1], 1 }

</bundles_post_ra>
